<compile_context>
chip_gen: v7x
topology: tpu7x:2x2x1
jax: 0.10.0
libtpu: 0.0.40
codegen_flags: <defaults>
</compile_context>

<pallas_src>
import functools
import math

import jax
import jax.numpy as jnp
from jax import lax
from jax.experimental import pallas as pl
from jax.experimental.pallas import tpu as pltpu

HIDDEN = 32          # config.hidden_size (small synthetic size)
OUT_DIM = 768        # decoder output dim (fixed in the module)
LN_EPS = 1e-12       # config.layer_norm_eps (HF default)

_VMEM_BUDGET = 14 * 1024 * 1024   # stays under v5e's 16 MiB default scoped VMEM


def _round_up(x, m):
    return ((x + m - 1) // m) * m


def _head_kernel(x_ref, w1_ref, b1_ref, w2_ref, b2_ref, o_ref):
    # dense: x @ W1^T + b1   (bf16 operands, f32 MXU accumulation)
    x = x_ref[...].astype(jnp.bfloat16)
    h = jnp.dot(x, w1_ref[...], preferred_element_type=jnp.float32) + b1_ref[...]

    # gelu (erf formulation, exactly the PyTorch reference) — f32 on VPU/EUP
    h = h * 0.5 * (1.0 + lax.erf(h * (1.0 / math.sqrt(2.0))))

    # LayerNorm over hidden axis (affine gamma/beta folded into W2/b2 on host) — f32
    mean = jnp.mean(h, axis=-1, keepdims=True)
    centered = h - mean
    var = jnp.mean(centered * centered, axis=-1, keepdims=True)
    h = centered * lax.rsqrt(var + LN_EPS)

    # decoder: h @ (gamma * W2^T) + (beta @ W2^T + bias) — bf16 operands, f32 acc
    out = jnp.dot(h.astype(w2_ref.dtype), w2_ref[...],
                  preferred_element_type=jnp.float32)
    o_ref[...] = (out + b2_ref[...]).astype(o_ref.dtype)


def prepare_head_params(params):
    """Hoisted once per model: transpose weights, fold LN affine, cast to bf16."""
    w1_t = jnp.asarray(params["w1"], jnp.float32).T                # (H, H)
    b1 = jnp.asarray(params["b1"], jnp.float32).reshape(1, -1)     # (1, H)
    gamma = jnp.asarray(params["ln_gamma"], jnp.float32)           # (H,)
    beta = jnp.asarray(params["ln_beta"], jnp.float32)             # (H,)
    w2_t = jnp.asarray(params["w2"], jnp.float32).T                # (H, OUT_DIM)
    w2_f = gamma[:, None] * w2_t                                   # (H, OUT_DIM)
    b2_f = (beta @ w2_t + jnp.asarray(params["bias"], jnp.float32)).reshape(1, -1)
    return dict(
        w1_t=w1_t.astype(jnp.bfloat16),   # bf16 MXU operands
        b1=b1,                            # biases stay f32 (added post-accumulation)
        w2_f=w2_f.astype(jnp.bfloat16),
        b2_f=b2_f,
    )


def _pick_tile_m(M, requested, out_bytes):
    """Static tile choice: multiple of 8, >=2 grid steps when possible, VMEM-budgeted."""
    tile = max(8, (min(requested, _round_up(M, 8)) // 8) * 8)
    # megacore-aware: v7x has 2 TCs; keep at least 2 grid steps for moderate M.
    if M > 8 and pl.cdiv(M, tile) < 2:
        tile = min(tile, max(8, _round_up(pl.cdiv(M, 2), 8)))
    # VMEM: 2 double-buffered out blocks + f32 decoder-dot temp + 2 input blocks.
    def vmem_bytes(t):
        return 2 * t * OUT_DIM * out_bytes + t * OUT_DIM * 4 + 2 * t * HIDDEN * 4
    while tile > 8 and vmem_bytes(tile) > _VMEM_BUDGET:
        tile = max(8, ((tile // 2) // 8) * 8)
    return tile


@functools.partial(jax.jit, static_argnames=("tile_m", "out_dtype"))
def visual_lm_prediction_head(x, prepared, *, tile_m=2048, out_dtype=jnp.bfloat16):
    """x: (batch, seq, hidden) -> (batch, seq, 768) in out_dtype (default bf16)."""
    B, S, H = x.shape
    M = B * S
    x2d = x.reshape(M, H)

    out_bytes = jnp.dtype(out_dtype).itemsize
    tile_m = _pick_tile_m(M, tile_m, out_bytes)
    grid = (pl.cdiv(M, tile_m),)   # partial last block: masked writes, no padding copy

    w1_t = prepared["w1_t"]
    b1 = prepared["b1"]
    w2_f = prepared["w2_f"]
    b2_f = prepared["b2_f"]

    cost = pl.CostEstimate(
        flops=2 * M * H * (H + OUT_DIM),
        transcendentals=M * H,
        bytes_accessed=(
            M * H * x.dtype.itemsize                  # activations in
            + M * OUT_DIM * out_bytes                 # activations out
            + (H * H + H * OUT_DIM) * 2               # bf16 weights
            + (H + OUT_DIM) * 4                       # f32 biases
        ),
    )

    out2d = pl.pallas_call(
        _head_kernel,
        out_shape=jax.ShapeDtypeStruct((M, OUT_DIM), out_dtype),
        grid_spec=pltpu.PrefetchScalarGridSpec(
            num_scalar_prefetch=0,
            grid=grid,
            in_specs=[
                pl.BlockSpec((tile_m, H), lambda i: (i, 0)),      # x rows
                pl.BlockSpec((H, H), lambda i: (0, 0)),           # W1^T (VMEM-resident)
                pl.BlockSpec((1, H), lambda i: (0, 0)),           # b1
                pl.BlockSpec((H, OUT_DIM), lambda i: (0, 0)),     # gamma-folded W2^T
                pl.BlockSpec((1, OUT_DIM), lambda i: (0, 0)),     # folded decoder bias
            ],
            out_specs=pl.BlockSpec((tile_m, OUT_DIM), lambda i: (i, 0)),
        ),
        compiler_params=pltpu.CompilerParams(
            dimension_semantics=("parallel",)),
        cost_estimate=cost,
    )(x2d, w1_t, b1, w2_f, b2_f)

    return out2d.reshape(B, S, OUT_DIM)


def init_params(key, hidden=HIDDEN):
    k1, k2, k3, k4 = jax.random.split(key, 4)
    w1 = jax.random.normal(k1, (hidden, hidden), jnp.float32) * (1.0 / math.sqrt(hidden))
    b1 = jnp.zeros((hidden,), jnp.float32)
    ln_gamma = 1.0 + 0.1 * jax.random.normal(k3, (hidden,), jnp.float32)
    ln_beta = 0.1 * jax.random.normal(k4, (hidden,), jnp.float32)
    w2 = jax.random.normal(k2, (OUT_DIM, hidden), jnp.float32) * (1.0 / math.sqrt(hidden))
    bias = jnp.zeros((OUT_DIM,), jnp.float32)   # self.bias = zeros(768)
    return dict(w1=w1, b1=b1, ln_gamma=ln_gamma, ln_beta=ln_beta, w2=w2, bias=bias)


def _reference(x, p):
    h = x @ p["w1"].T + p["b1"]
    h = h * 0.5 * (1.0 + lax.erf(h / jnp.sqrt(2.0)))
    mean = jnp.mean(h, axis=-1, keepdims=True)
    var = jnp.mean((h - mean) ** 2, axis=-1, keepdims=True)
    h = (h - mean) / jnp.sqrt(var + LN_EPS)
    h = h * p["ln_gamma"] + p["ln_beta"]
    return h @ p["w2"].T + p["bias"]


if __name__ == "__main__":
    key = jax.random.PRNGKey(0)
    kx, kp, kx2 = jax.random.split(key, 3)
    params = init_params(kp)
    prepared = prepare_head_params(params)   # hoisted: transposes + LN fold + bf16 cast

    # main test: batch=2, seq=8, hidden=32 — f32 output path (strict-ish accuracy)
    batch, seq = 2, 8
    x = jax.random.normal(kx, (batch, seq, HIDDEN), jnp.float32)
    out_f32 = jax.block_until_ready(
        visual_lm_prediction_head(x, prepared, out_dtype=jnp.float32))
    ref = _reference(x, params)
    assert out_f32.shape == (batch, seq, OUT_DIM)
    # bf16 MXU operands with f32 accumulation => loosened tolerance vs. f32 reference
    assert jnp.allclose(out_f32, ref, atol=5e-2, rtol=5e-2)

    # default bf16 output path (halves writeback bytes)
    out_bf16 = jax.block_until_ready(visual_lm_prediction_head(x, prepared))
    assert out_bf16.dtype == jnp.bfloat16
    assert jnp.allclose(out_bf16.astype(jnp.float32), ref, atol=1e-1, rtol=1e-1)

    # secondary test: row count (3*5=15) not a multiple of the tile -> masked partial block
    x2 = jax.random.normal(kx2, (3, 5, HIDDEN), jnp.float32)
    out2 = jax.block_until_ready(
        visual_lm_prediction_head(x2, prepared, out_dtype=jnp.float32))
    ref2 = _reference(x2, params)
    assert out2.shape == (3, 5, OUT_DIM)
    assert jnp.allclose(out2, ref2, atol=5e-2, rtol=5e-2)

    print("KERNEL_OK")
</pallas_src>

<mosaic_0001>
module attributes {stable_mosaic.version = 11 : i64} {
  func.func @_head_kernel(%arg0: i32, %arg1: memref<8x32xf32, #tpu.memory_space<vmem>>, %arg2: memref<32x32xbf16, #tpu.memory_space<vmem>>, %arg3: memref<1x32xf32, #tpu.memory_space<vmem>>, %arg4: memref<32x768xbf16, #tpu.memory_space<vmem>>, %arg5: memref<1x768xf32, #tpu.memory_space<vmem>>, %arg6: memref<8x768xf32, #tpu.memory_space<vmem>>) attributes {dimension_semantics = [#tpu.dimension_semantics<parallel>], iteration_bounds = array<i64: 2>, scalar_prefetch = 0 : i64, scratch_operands = 0 : i64, tpu.core_type = #tpu.core_type<tc>, window_params = [{transform_indices = @transform_0, window_bounds = array<i64: 8, 32>}, {pipeline_mode = #tpu.pipeline_mode<synchronous>, transform_indices = @transform_1, window_bounds = array<i64: 32, 32>}, {pipeline_mode = #tpu.pipeline_mode<synchronous>, transform_indices = @transform_2, window_bounds = array<i64: 1, 32>}, {pipeline_mode = #tpu.pipeline_mode<synchronous>, transform_indices = @transform_3, window_bounds = array<i64: 32, 768>}, {pipeline_mode = #tpu.pipeline_mode<synchronous>, transform_indices = @transform_4, window_bounds = array<i64: 1, 768>}, {transform_indices = @transform_5, window_bounds = array<i64: 8, 768>}]} {
    %c0 = arith.constant 0 : index
    %c0_0 = arith.constant 0 : index
    %0 = vector.load %arg1[%c0, %c0_0] : memref<8x32xf32, #tpu.memory_space<vmem>>, vector<8x32xf32>
    %1 = arith.truncf %0 : vector<8x32xf32> to vector<8x32xbf16>
    %c0_1 = arith.constant 0 : index
    %c0_2 = arith.constant 0 : index
    %2 = vector.load %arg2[%c0_1, %c0_2] : memref<32x32xbf16, #tpu.memory_space<vmem>>, vector<32x32xbf16>
    %cst = arith.constant dense<0.000000e+00> : vector<8x32xf32>
    %3 = tpu.matmul %1, %2, %cst {dimension_numbers = #tpu.dot_dimension_numbers<[1], [0], [0], [1], [0, 0, 1, 1], [], []>} : vector<8x32xbf16>, vector<32x32xbf16>, vector<8x32xf32> -> vector<8x32xf32>
    %c0_3 = arith.constant 0 : index
    %c0_4 = arith.constant 0 : index
    %4 = vector.load %arg3[%c0_3, %c0_4] : memref<1x32xf32, #tpu.memory_space<vmem>>, vector<1x32xf32>
    %5 = vector.broadcast %4 : vector<1x32xf32> to vector<8x32xf32>
    %6 = arith.addf %3, %5 : vector<8x32xf32>
    %cst_5 = arith.constant 5.000000e-01 : f32
    %7 = vector.broadcast %cst_5 : f32 to vector<8x32xf32>
    %8 = arith.mulf %6, %7 : vector<8x32xf32>
    %cst_6 = arith.constant 0.707106769 : f32
    %9 = vector.broadcast %cst_6 : f32 to vector<8x32xf32>
    %10 = arith.mulf %6, %9 : vector<8x32xf32>
    %11 = math.erf %10 : vector<8x32xf32>
    %cst_7 = arith.constant 1.000000e+00 : f32
    %12 = vector.broadcast %cst_7 : f32 to vector<8x32xf32>
    %13 = arith.addf %12, %11 : vector<8x32xf32>
    %14 = arith.mulf %8, %13 : vector<8x32xf32>
    %cst_8 = arith.constant dense<0.000000e+00> : vector<8xf32>
    %15 = vector.multi_reduction <add>, %14, %cst_8 [1] : vector<8x32xf32> to vector<8xf32>
    %16 = vector.shape_cast %15 : vector<8xf32> to vector<8x1xf32>
    %cst_9 = arith.constant 3.200000e+01 : f32
    %17 = vector.broadcast %cst_9 : f32 to vector<8x1xf32>
    %18 = arith.divf %16, %17 : vector<8x1xf32>
    %19 = vector.broadcast %18 : vector<8x1xf32> to vector<8x32xf32>
    %20 = arith.subf %14, %19 : vector<8x32xf32>
    %21 = arith.mulf %20, %20 : vector<8x32xf32>
    %cst_10 = arith.constant dense<0.000000e+00> : vector<8xf32>
    %22 = vector.multi_reduction <add>, %21, %cst_10 [1] : vector<8x32xf32> to vector<8xf32>
    %23 = vector.shape_cast %22 : vector<8xf32> to vector<8x1xf32>
    %cst_11 = arith.constant 3.200000e+01 : f32
    %24 = vector.broadcast %cst_11 : f32 to vector<8x1xf32>
    %25 = arith.divf %23, %24 : vector<8x1xf32>
    %cst_12 = arith.constant 9.99999996E-13 : f32
    %26 = vector.broadcast %cst_12 : f32 to vector<8x1xf32>
    %27 = arith.addf %25, %26 : vector<8x1xf32>
    %28 = math.rsqrt %27 : vector<8x1xf32>
    %29 = vector.broadcast %28 : vector<8x1xf32> to vector<8x32xf32>
    %30 = arith.mulf %20, %29 : vector<8x32xf32>
    %31 = arith.truncf %30 : vector<8x32xf32> to vector<8x32xbf16>
    %c0_13 = arith.constant 0 : index
    %c0_14 = arith.constant 0 : index
    %32 = vector.load %arg4[%c0_13, %c0_14] : memref<32x768xbf16, #tpu.memory_space<vmem>>, vector<32x768xbf16>
    %cst_15 = arith.constant dense<0.000000e+00> : vector<8x768xf32>
    %33 = tpu.matmul %31, %32, %cst_15 {dimension_numbers = #tpu.dot_dimension_numbers<[1], [0], [0], [1], [0, 0, 1, 1], [], []>} : vector<8x32xbf16>, vector<32x768xbf16>, vector<8x768xf32> -> vector<8x768xf32>
    %c0_16 = arith.constant 0 : index
    %c0_17 = arith.constant 0 : index
    %34 = vector.load %arg5[%c0_16, %c0_17] : memref<1x768xf32, #tpu.memory_space<vmem>>, vector<1x768xf32>
    %35 = vector.broadcast %34 : vector<1x768xf32> to vector<8x768xf32>
    %36 = arith.addf %33, %35 : vector<8x768xf32>
    %c0_18 = arith.constant 0 : index
    %c0_19 = arith.constant 0 : index
    %37 = vector.load %arg6[%c0_18, %c0_19] : memref<8x768xf32, #tpu.memory_space<vmem>>, vector<8x768xf32>
    tpu.vector_store %arg6[%c0_18, %c0_19], %36 {strides = array<i32>} : memref<8x768xf32, #tpu.memory_space<vmem>>, vector<8x768xf32>,
    return
  }
  func.func @transform_0(%arg0: i32) -> (i32, i32) {
    %c0_i32 = arith.constant 0 : i32
    %c0_i32_0 = arith.constant 0 : i32
    return %arg0, %c0_i32 : i32, i32
  }
  func.func @transform_1(%arg0: i32) -> (i32, i32) {
    %c0_i32 = arith.constant 0 : i32
    %c0_i32_0 = arith.constant 0 : i32
    %c0_i32_1 = arith.constant 0 : i32
    return %c0_i32, %c0_i32_0 : i32, i32
  }
  func.func @transform_2(%arg0: i32) -> (i32, i32) {
    %c0_i32 = arith.constant 0 : i32
    %c0_i32_0 = arith.constant 0 : i32
    %c0_i32_1 = arith.constant 0 : i32
    return %c0_i32, %c0_i32_0 : i32, i32
  }
  func.func @transform_3(%arg0: i32) -> (i32, i32) {
    %c0_i32 = arith.constant 0 : i32
    %c0_i32_0 = arith.constant 0 : i32
    %c0_i32_1 = arith.constant 0 : i32
    return %c0_i32, %c0_i32_0 : i32, i32
  }
  func.func @transform_4(%arg0: i32) -> (i32, i32) {
    %c0_i32 = arith.constant 0 : i32
    %c0_i32_0 = arith.constant 0 : i32
    %c0_i32_1 = arith.constant 0 : i32
    return %c0_i32, %c0_i32_0 : i32, i32
  }
  func.func @transform_5(%arg0: i32) -> (i32, i32) {
    %c0_i32 = arith.constant 0 : i32
    %c0_i32_0 = arith.constant 0 : i32
    return %arg0, %c0_i32 : i32, i32
  }
}

</mosaic_0001>

<bundles_post_ra>
// kernel: visual_lm_prediction_head.1
= control target key start
LH: loop header
LB: loop body
LE: loop exit
PB: predicated region body
PF: predicated region fallthrough
CT: control target
= control target key end

     0   :  { %10 = vsyncpa [#allocation3], 0  ;;  %s1284_s0 = inlined_call_operand.hbm [shape: f32[16,32], index: 0, kind: input, shape index: {}]   ;;  %s1285_s1 = inlined_call_operand.hbm [shape: bf16[32,32], index: 1, kind: input, shape index: {}]   ;;  %s1286_s2 = inlined_call_operand.vmem [shape: f32[1,32], index: 2, kind: input, shape index: {}]   ;;  %s1287_s3 = inlined_call_operand.hbm [shape: bf16[32,768], index: 3, kind: input, shape index: {}]   ;;  %s1288_s4 = inlined_call_operand.vmem [shape: f32[1,768], index: 4, kind: input, shape index: {}]   ;;  %s1289_s5 = inlined_call_operand.hbm [shape: f32[16,768], index: 5, kind: output, shape index: {}]  }
   0x1   :  { %12 = vsyncpa [#allocation3 + $0x1], 0 }
   0x2   :  { %13 = vsyncpa [#allocation6], 0 }
   0x3   :  { %14 = vsyncpa [#allocation4], 0 }
   0x4   :  { %16 = vsyncpa [#allocation4 + $0x1], 0  ;;  %s1042_s18 = smov 0   ;;  %s1044_s19 = smov 0  }
   0x5   :  { %s1046_s20 = smov 0   ;;  %s1048_s21 = smov 0  }
   0x6 LB: > { %s1063_s22 = sadd.s32 4294967295, %s999_s21   ;;  %s699_s23 = sadd.s32 4294967294, %s999_s21   ;;  %s999_s21 = sphi %s1048_s21, %s1309_s21   ;;  %s995_s20 = sphi %s1046_s20, %s1308_s20   ;;  %s991_s19 = sphi %s1044_s19, %s1307_s19   ;;  %s987_s18 = sphi %s1042_s18, %s1306_s18  }
   0x7   : > { %p42_p0 = scmp.ne.s32.totalorder %s991_s19, %s987_s18  ;;  %p1290_p1 = scmp.eq.s32.totalorder %s1063_s22, 0 }
   0x8   : > { %p156_p3 = scmp.eq.s32.totalorder %s699_s23, 1  ;;  %p700_p5 = scmp.ge.s32.totalorder %s999_s21, 1 }
   0x9   : > { %p1072_p4 = por %p1290_p1, %p42_p0  ;;  %p163_p7 = scmp.lt.s32.totalorder %s999_s21, 3 }
   0xa   : > { %p1077_p6 = por %p156_p3, %p42_p0  ;;  %s1001_s27 = smov [#allocation5]  }
   0xb   : > { %s1293_s24 = scalar_select %p1072_p4, 1, 0 }
   0xc   : > { %s1294_s25 = scalar_select %p1077_p6, 1, 0 }
   0xd   : > { %p1082_p8 = pnand %p700_p5, %p163_p7  ;;  %s175_s28 = sshll.u32 %s1001_s27, 4  ;;  %s1086_s28 = int_to_ptr.vmem [resolvable:$true] %s175_s28 }
   0xe   : > { %s1002_s30 = smov [#allocation7]   ;;  %s843_s9 = scalar_lea.hbm %s1285_s1, 256 }
   0xf   : > { %p757_p9 = pneg %p1082_p8  ;;  %s191_s6 = sshll.u32 %s1002_s30, 4  ;;  %s1097_s6 = int_to_ptr.vmem [resolvable:$true] %s191_s6 }
  0x10   : > { %p844_p12 = scmp.ne.s32.totalorder %s1285_s1, %s843_s9  ;;  %p850_p5 = scmp.lt.u32.totalorder %s843_s9, %s1285_s1 }
  0x11   : > { %p1093_p11 = pnand %p757_p9, %p1290_p1 }
  0x13   : > { %p845_p13 = pneg %p1093_p11 }
  0x15   : > { %p846_p0 = pnand %p845_p13, %p844_p12 }
  0x17   : > { %p847_p3 = pneg %p846_p0 }
  0x19   : > { %p852_p7 = pnand %p850_p5, %p847_p3 }
  0x1b   : > { %855 = shalt.err (!%p852_p7)
}
  0x1c   : > { %s856_s14 = scalar_lea.vmem %s1086_s28, 256  ;;  %p864_p2 = scmp.lt.s32.totalorder %s1086_s28, %s1086_s28 }
  0x1d   : > { %p857_p9 = scmp.ne.s32.totalorder %s1086_s28, %s856_s14  ;;  %p865_p12 = scmp.lt.s32.totalorder %s856_s14, %s856_s14 }
  0x1f   : > { %p859_p10 = pnand %p857_p9, %p845_p13  ;;  %p866_p0 = por %p865_p12, %p864_p2 }
  0x21   : > { %p860_p1 = pneg %p859_p10 }
  0x23   : > { %p867_p6 = pnand %p866_p0, %p860_p1 }
  0x25   : > { %870 = shalt.err (!%p867_p6)
}
  0x26   : > { %s1003_s15 = smov 64   ;;  %s1004_s16 = smov 4  }
  0x27   : > { %760 = dma.hbm_to_vmem [thread:$0]  (!%p1093_p11), %s1285_s1, 256, %s1086_s28, [#allocation6], %s1003_s15, %s1003_s15, %s1004_s16  }
  0x28   : > { %s871_s7 = scalar_lea.hbm %s1287_s3, 1536 }
  0x29   : > { %p872_p2 = scmp.ne.s32.totalorder %s1287_s3, %s871_s7  ;;  %p878_p10 = scmp.lt.u32.totalorder %s871_s7, %s1287_s3 }
  0x2b   : > { %p874_p1 = pnand %p872_p2, %p845_p13 }
  0x2d   : > { %p875_p6 = pneg %p874_p1 }
  0x2f   : > { %p880_p3 = pnand %p878_p10, %p875_p6 }
  0x31   : > { %883 = shalt.err (!%p880_p3)
}
  0x32   : > { %s884_s28 = scalar_lea.vmem %s1097_s6, 1536  ;;  %p892_p12 = scmp.lt.s32.totalorder %s1097_s6, %s1097_s6 }
  0x33   : > { %p885_p5 = scmp.ne.s32.totalorder %s1097_s6, %s884_s28  ;;  %p893_p0 = scmp.lt.s32.totalorder %s884_s28, %s884_s28 }
  0x35   : > { %p887_p7 = pnand %p885_p5, %p845_p13  ;;  %p894_p2 = por %p893_p0, %p892_p12 }
  0x37   : > { %p888_p9 = pneg %p887_p7 }
  0x39   : > { %p895_p1 = pnand %p894_p2, %p888_p9 }
  0x3b   : > { %898 = shalt.err (!%p895_p1)
}
  0x3c   : > { %s1005_s12 = smov 384   ;;  %s1006_s13 = smov 24  }
  0x3d   : > { %763 = dma.hbm_to_vmem [thread:$0]  (!%p1093_p11), %s1287_s3, 1536, %s1097_s6, [#allocation6], %s1005_s12, %s1005_s12, %s1006_s13  }
  0x3e   : > { %s1152_s16 = sadd.s32 1, %s999_s21   ;;  %s29_s23 = sadd.s32 1, %s995_s20 }
  0x3f   : > { %s26_s17 = ssub.s32 %s999_s21, %s1152_s16  ;;  %p36_p6 = scmp.ne.s32.totalorder %s995_s20, %s991_s19 }
  0x40   : > { %p27_p13 = scmp.eq.s32.totalorder %s26_s17, 0  ;;  %p37_p10 = scmp.eq.s32.totalorder %s999_s21, 0 }
  0x41   : > { %p1297_p5 = scmp.eq.s32.totalorder %s1063_s22, 1  ;;  %p774_p9 = scmp.lt.s32.totalorder %s999_s21, 2 }
  0x42   : > { %s1161_s27 = scalar_select %p27_p13, %s995_s20, %s29_s23  }
  0x43   : > { %p38_p3 = por %p37_p10, %p36_p6  ;;  %p1165_p7 = por %p1297_p5, %p36_p6 }
  0x44   : > { %s208_s29 = sand.u32 1, %s995_s20   ;;  %s705_s6 = sshll.u32 %s999_s21, 7 }
  0x45   : > { %s1298_s30 = scalar_select %p1165_p7, 1, 0 }
  0x46   : > { %s704_s7 = sshll.u32 %s208_s29, 3  ;;  %s1175_s10 = scalar_lea.hbm %s1284_s0, %s705_s6 }
  0x47   : > { %s212_s11 = scalar_lea.vmem [#allocation2], %s704_s7  ;;  %p1179_p11 = pnand %p774_p9, %p38_p3 }
  0x48   : > { %s219_s28 = sshll.u32 %s212_s11, 4  ;;  %s209_s13 = scalar_lea.sflag [#allocation3], %s208_s29  ;;  %s1177_s28 = int_to_ptr.vmem [resolvable:$true] %s219_s28 }
  0x49   : > { %s899_s14 = scalar_lea.hbm %s1175_s10, 128  ;;  %p901_p0 = pneg %p1179_p11 }
  0x4a   : > { %p900_p12 = scmp.ne.s32.totalorder %s1175_s10, %s899_s14  ;;  %s904_s23 = scalar_lea.hbm %s1284_s0, 256 }
  0x4b   : > { %p905_p13 = scmp.lt.u32.totalorder %s1175_s10, %s1284_s0  ;;  %p906_p6 = scmp.lt.u32.totalorder %s904_s23, %s899_s14 }
  0x4c   : > { %p902_p2 = pnand %p901_p0, %p900_p12  ;;  %p908_p3 = scmp.lt.u32.totalorder %s899_s14, %s1175_s10 }
  0x4d   : > { %p907_p10 = por %p906_p6, %p905_p13 }
  0x4e   : > { %p903_p1 = pneg %p902_p2 }
  0x4f   : > { %p909_p5 = por %p908_p3, %p907_p10 }
  0x51   : > { %p910_p9 = pnand %p909_p5, %p903_p1 }
  0x53   : > { %913 = shalt.err (!%p910_p9)
}
  0x54   : > { %s914_s29 = scalar_lea.vmem %s1177_s28, 128  ;;  %s1007_s8 = smov [#allocation2]  }
  0x55   : > { %p915_p12 = scmp.ne.s32.totalorder %s1177_s28, %s914_s29  ;;  %s919_s9 = sshll.u32 %s1007_s8, 4  ;;  %s920_s9 = int_to_ptr.vmem [resolvable:$false] %s919_s9 }
  0x56   : > { %s921_s11 = scalar_lea.vmem %s920_s9, 256  ;;  %p922_p4 = scmp.lt.s32.totalorder %s1177_s28, %s920_s9 }
  0x57   : > { %p917_p2 = pnand %p915_p12, %p901_p0  ;;  %p923_p13 = scmp.lt.s32.totalorder %s921_s11, %s914_s29 }
  0x59   : > { %p918_p7 = pneg %p917_p2  ;;  %p924_p6 = por %p923_p13, %p922_p4 }
  0x5b   : > { %p925_p10 = pnand %p924_p6, %p918_p7 }
  0x5d   : > { %928 = shalt.err (!%p925_p10)
}
  0x5e   : > { %767 = dma.hbm_to_vmem [thread:$0]  (!%p1179_p11), %s1175_s10, 128, %s1177_s28, %s209_s13  }
  0x5f   : > { %228 = sbr.rel (%p1082_p8) target bundleno = 894 (0x37e), region = 40  ;;  %s1211_s14 = sand.u32 (!%p1082_p8), 1, %s991_s19  }
  0x60   : > { %s707_s15 = sshll.u32 (!%p1082_p8), %s1211_s14, 3  ;;  %s231_s17 = scalar_lea.sflag (!%p1082_p8), [#allocation3], %s1211_s14 }
  0x61   : > { %s234_s23 = scalar_lea.vmem (!%p1082_p8), [#allocation2], %s707_s15  ;;  %p1300_p4 = scmp.ne.s32.totalorder (!%p1082_p8), %s1293_s24, 0 }
  0x66   : > { %974 = dma.done.wait (%p1300_p4), %s231_s17, 128  }
  0x67   : > { %976 = vsyncadd (%p1300_p4), %s231_s17, 4294967168  ;;  %p1301_p7 = scmp.eq.s32.totalorder %s1063_s22, 0 }
  0x69   : > { %978 = dma.done.wait (%p1301_p7), [#allocation6], 1792   ;;  %p1302_p11 = pmov %p1301_p7 }
  0x6a   : > { %v1008_v0 = vmov 0.0   ;;  %vm1009_vm0 = vmmov 0   ;;  %v819_v1 = vld [vmem:[#allocation5] sm:$0xff]   ;;  %v820_v2 = vld [vmem:[#allocation5 + $0x8] sm:$0xff]   ;;  %v270_v3 = vld [vmem:[%s234_s23] sm:$0xff]  ;;  %vm295_vm1 = vcmask 261120   ;;  %v373_v41 = vlaneseq }
  0x6b   : > { %980 = vsyncadd (%p1302_p11), [#allocation6], 4294965504  ;;  %735 = vmatprep.subr.bf16.mxu0 %v1008_v0  ;;  %739 = vmatprep.mubr.msk.bf16.mxu0 %vm1009_vm0, %v1008_v0  ;;  %v271_v4 = vpack.c.bf16 %v270_v3, %v270_v3  ;;  %v710_v5 = vld [vmem:[%s1286_s2] ss:$0 sm:$0xff]  ;;  %v821_v22 = vld [vmem:[#allocation7 + $0x4] ss:$24 sps:$4 sm:$0xff]  }
  0x6c   : > { %736 = vmatpush3.bf16.msra.mxu0 %v819_v1  ;;  %v823_v23 = vld [vmem:[#allocation7] ss:$24 sps:$4 sm:$0xff]   ;;  %v826_v25 = vld [vmem:[#allocation7 + $0xc] ss:$24 sps:$4 sm:$0xff]   ;;  %466 = vmatprep.subr.bf16.mxu1 %v821_v22  ;;  %v832_v27 = vld [vmem:[#allocation7 + $0x3c] ss:$24 sps:$4 sm:$0xff]  }
  0x6d   : > { %737 = vmatprep.subr.bf16.mxu0 %v1008_v0  ;;  %v824_v24 = vld [vmem:[#allocation7 + $0x8] ss:$24 sps:$4 sm:$0xff]   ;;  %v827_v26 = vld [vmem:[#allocation7 + $0x34] ss:$24 sps:$4 sm:$0xff]   ;;  %467 = vmatpush1.bf16.msra.mxu1 %v823_v23  ;;  %v830_v29 = vld [vmem:[#allocation7 + $0x38] ss:$24 sps:$4 sm:$0xff]  }
  0x6e   : > { %v829_v28 = vld [vmem:[#allocation7 + $0x30] ss:$24 sps:$4 sm:$0xff]   ;;  %468 = vmatprep.subr.bf16.mxu1 %v827_v26  ;;  %v835_v30 = vld [vmem:[#allocation7 + $0x14] ss:$24 sps:$4 sm:$0xff]   ;;  %v1010_v31 = vmov 0   ;;  %v374_v42 = vshrl.u32 %v373_v41, 7 }
  0x6f   : > { %498 = vmatprep.mubr.bf16.mxu1 %v1010_v31  ;;  %v833_v37 = vld [vmem:[#allocation7 + $0x10] ss:$24 sps:$4 sm:$0xff]   ;;  %v838_v39 = vld [vmem:[#allocation7 + $0x44] ss:$24 sps:$4 sm:$0xff]   ;;  %v836_v40 = vld [vmem:[#allocation7 + $0x40] ss:$24 sps:$4 sm:$0xff]  }
  0x70   : > { %738 = vmatpush3.bf16.msra.mxu0 %v820_v2  ;;  %v375_v43 = vsub.s32 0, %v374_v42  ;;  %v383_v44 = vsub.s32 2, %v374_v42  ;;  %v371_v45 = vld [vmem:[%s1288_s4] sm:$0x3f]  ;;  %v379_v46 = vsub.s32 1, %v374_v42  ;;  %v387_v47 = vsub.s32 3, %v374_v42 }
  0x71   : > { %507 = vmatprep.subr.bf16.mxu0 %v826_v25  ;;  %469 = vmatpush1.bf16.msra.mxu1 %v829_v28  ;;  %s743_s12 = smul.u32 48, %s1211_s14  ;;  %v391_v58 = vsub.s32 4, %v374_v42  ;;  %v395_v63 = vsub.s32 5, %v374_v42  ;;  %p1303_p0 = scmp.ne.s32.totalorder %s1298_s30, 0 }
  0x72   : > { %548 = vmatprep.subr.bf16.mxu1 %v835_v30  ;;  %v376_v48 = vrot.slane %v371_v45, %v375_v43  ;;  %v384_v49 = vrot.slane %v371_v45, %v383_v44  ;;  %v380_v50 = vrot.slane %v371_v45, %v379_v46  ;;  %v388_v51 = vrot.slane %v371_v45, %v387_v47  ;;  %s744_s7 = smul.u32 768, %s1063_s22  ;;  %s596_s22 = scalar_lea.sflag [#allocation4], %s1211_s14 }
  0x73   : > { %740 = vmatmul.mubr.msk.bf16.vlgmr.msra.gmra.mrb[0].mxu0 %vm295_vm1, %v271_v4  ;;  %s268_s13 = scalar_lea.vmem [#allocation8], %s743_s12  ;;  %v392_v2 = vrot.slane %v371_v45, %v391_v58  ;;  %v396_v3 = vrot.slane %v371_v45, %v395_v63  ;;  %s1011_s15 = smov [#allocation8]  }
  0x74   : > { %508 = vmatpush1.bf16.msra.mxu0 %v824_v24  ;;  %539 = vmatprep.mubr.bf16.mxu0 %v1010_v31  ;;  %s610_s6 = sshll.u32 %s268_s13, 4  ;;  %s1240_s9 = scalar_lea.hbm %s1289_s5, %s744_s7  ;;  %s1242_s6 = int_to_ptr.vmem [resolvable:$true] %s610_s6 }
  0x75   : > { %509 = vmatprep.subr.bf16.mxu0 %v832_v27  ;;  %s929_s11 = scalar_lea.vmem %s1242_s6, 768  ;;  %s933_s17 = sshll.u32 %s1011_s15, 4  ;;  %s934_s17 = int_to_ptr.vmem [resolvable:$false] %s933_s17 }
  0x76   : > { %p930_p8 = scmp.ne.s32.totalorder %s1242_s6, %s929_s11  ;;  %s935_s23 = scalar_lea.vmem %s934_s17, 1536 }
  0x77   : > { %p936_p5 = scmp.lt.s32.totalorder %s1242_s6, %s934_s17  ;;  %p937_p9 = scmp.lt.s32.totalorder %s935_s23, %s929_s11 }
  0x78   : > { %510 = vmatpush1.bf16.msra.mxu0 %v830_v29  ;;  %p931_p1 = pnand %p930_p8, %p1303_p0 }
  0x79   : > { %p938_p12 = por %p937_p9, %p936_p5 }
  0x7a   : > { %p932_p3 = pneg %p931_p1 }
  0x7c   : > { %p939_p2 = pnand %p938_p12, %p932_p3 }
 0x146   : > { %v333_v6 = vpop.f32.mrb[0].mxu0 }
 0x147   : > { %v334_v7 = vadd.f32 %v710_v5, %v333_v6  ;;  %v741_v8 = vpop.f32.mrb[1].mxu0 }
 0x148   : > { %v336_v9 = vpop.f32.mrb[2].mxu0 }
 0x149   : > { %v340_v10 = vmul.f32 0.70710677, %v334_v7  ;;  %v742_v11 = vpop.f32.mrb[3].mxu0  ;;  %v339_v13 = vmul.f32 0.5, %v334_v7 }
 0x14b   : > { %839 = verf.f32 %v340_v10 }
 0x155   : > { %v840_v12 = vpop.eup %839 }
 0x156   : > { %v342_v14 = vadd.f32 1.0, %v840_v12 }
 0x158   : > { %v343_v15 = vmul.f32 %v342_v14, %v339_v13 }
 0x15a   : > { %v344_v16 = vsel %vm295_vm1, %v343_v15, 0.0 }
 0x15b   : > { %345 = vadd.xlane.f32.xlu0 %v344_v16 }
 0x1e8   : > { %v346_v17 = vpop.xlane.xlu0 %345 }
 0x1e9   : > { %v348_v18 = vmul.f32 0.03125, %v346_v17 }
 0x1eb   : > { %v349_v19 = vsub.f32 %v343_v15, %v348_v18 }
 0x1ed   : > { %v350_v20 = vmul.f32 %v349_v19, %v349_v19 }
 0x1ef   : > { %v351_v21 = vsel %vm295_vm1, %v350_v20, 0.0 }
 0x1f0   : > { %352 = vadd.xlane.f32.xlu0 %v351_v21 }
 0x27d   : > { %v353_v32 = vpop.xlane.xlu0 %352 }
 0x27e   : > { %v354_v33 = vmul.f32 0.03125, %v353_v32 }
 0x280   : > { %v355_v34 = vadd.f32 1e-12, %v354_v33 }
 0x282   : > { %841 = vrsqrt.f32 %v355_v34 }
 0x28c   : > { %v842_v35 = vpop.eup %841 }
 0x28d   : > { %v357_v36 = vmul.f32 %v842_v35, %v349_v19 }
 0x28f   : > { %v358_v38 = vpack.c.bf16 %v357_v36, %v357_v36 }
 0x291   : > { %726 = vmatmul.mubr.msk.bf16.vlgmr.msra.gmra.mrb[0].mxu1 %vm295_vm1, %v358_v38  ;;  %727 = vmatmul.mubr.msk.bf16.vlgmr.msra.gmra.mrb[4].mxu0 %vm295_vm1, %v358_v38 }
 0x292   : > { %549 = vmatpush1.bf16.msra.mxu1 %v833_v37  ;;  %580 = vmatprep.mubr.bf16.mxu1 %v1010_v31 }
 0x293   : > { %550 = vmatprep.subr.bf16.mxu1 %v838_v39 }
 0x296   : > { %551 = vmatpush1.bf16.msra.mxu1 %v836_v40 }
 0x299   : > { %728 = vmatmul.mubr.msk.bf16.vlgmr.msra.gmra.mrb[4].mxu1 %vm295_vm1, %v358_v38 }
 0x364   : > { %v500_v52 = vpop.f32.mrb[0].mxu1  ;;  %v541_v53 = vpop.f32.mrb[4].mxu0 }
 0x365   : > { %v501_v54 = vadd.f32 %v500_v52, %v376_v48  ;;  %v542_v55 = vadd.f32 %v541_v53, %v384_v49  ;;  %v502_v56 = vpop.f32.mrb[1].mxu1  ;;  %v543_v57 = vpop.f32.mrb[5].mxu0 }
 0x366   : > { %v503_v59 = vadd.f32 %v502_v56, %v380_v50  ;;  %v544_v60 = vadd.f32 %v543_v57, %v388_v51  ;;  %v504_v61 = vpop.f32.mrb[2].mxu1  ;;  %v545_v62 = vpop.f32.mrb[6].mxu0 }
 0x367   : > { %589 = vst [vmem:[%s268_s13] sm:$0xff] %v501_v54  ;;  %591 = vst [vmem:[%s268_s13 + $0x10] sm:$0xff] %v542_v55  ;;  %v505_v0 = vpop.f32.mrb[3].mxu1  ;;  %v546_v1 = vpop.f32.mrb[7].mxu0 }
 0x368   : > { %590 = vst [vmem:[%s268_s13 + $0x8] sm:$0xff] %v503_v59  ;;  %592 = vst [vmem:[%s268_s13 + $0x18] sm:$0xff] %v544_v60 }
 0x36c   : > { %v582_v4 = vpop.f32.mrb[4].mxu1 }
 0x36d   : > { %v583_v5 = vadd.f32 %v582_v4, %v392_v2  ;;  %v584_v6 = vpop.f32.mrb[5].mxu1 }
 0x36e   : > { %v585_v7 = vadd.f32 %v584_v6, %v396_v3  ;;  %v586_v8 = vpop.f32.mrb[6].mxu1 }
 0x36f   : > { %593 = vst [vmem:[%s268_s13 + $0x20] sm:$0xff] %v583_v5  ;;  %v587_v9 = vpop.f32.mrb[7].mxu1 }
 0x370   : > { %594 = vst [vmem:[%s268_s13 + $0x28] sm:$0xff] %v585_v7 }
 0x371   : > { %942 = shalt.err (!%p939_p2)
}
 0x372   : > { %s943_s14 = scalar_lea.hbm %s1240_s9, 768  ;;  %s947_s10 = scalar_lea.hbm %s1289_s5, 1536 }
 0x373   : > { %p944_p13 = scmp.ne.s32.totalorder %s1240_s9, %s943_s14  ;;  %p948_p4 = scmp.lt.u32.totalorder %s1240_s9, %s1289_s5 }
 0x374   : > { %p949_p7 = scmp.lt.u32.totalorder %s947_s10, %s943_s14  ;;  %p951_p8 = scmp.lt.u32.totalorder %s943_s14, %s1240_s9 }
 0x375   : > { %p945_p6 = pnand %p944_p13, %p1303_p0 }
 0x376   : > { %p950_p11 = por %p949_p7, %p948_p4 }
 0x377   : > { %p946_p10 = pneg %p945_p6 }
 0x378   : > { %p952_p1 = por %p951_p8, %p950_p11 }
 0x37a   : > { %p953_p3 = pnand %p952_p1, %p946_p10 }
 0x37c   : > { %956 = shalt.err (!%p953_p3)
}
 0x37d   : > { %755 = dma.vmem_to_hbm [thread:$0]  (%p1303_p0), %s1242_s6, 768, %s1240_s9, %s596_s22  }
 0x37e PF: > { %s622_s13 = sand.u32 1, %s987_s18   ;;  %p1304_p5 = scmp.ne.s32.totalorder %s1294_s25, 0 }
 0x37f   : > { %p1305_p9 = scmp.ge.s32.totalorder %s999_s21, 2  ;;  %s623_s7 = scalar_lea.sflag [#allocation4], %s622_s13 }
 0x381   : > { %p769_p12 = pnand %p1305_p9, %p1304_p5 }
 0x383   : > { %982 = dma.done.wait (!%p769_p12), %s623_s7, 768  }
 0x384   : > { %984 = vsyncadd (!%p769_p12), %s623_s7, 4294966528  ;;  %p19_p2 = scmp.ge.s32.totalorder %s1152_s16, 4   ;;  %s1306_s18 = smov %s991_s19 }
 0x385   : > { %s1307_s19 = smov %s995_s20  ;;  %s1308_s20 = smov %s1161_s27 }
 0x386   : > { %s1309_s21 = smov %s1152_s16  ;;  %21 = sbr.rel (!%p19_p2) target bundleno = 6 (0x6), region = 93 }
 0x38d   :  { %628 = vsyncpa [#allocation3], 1 }
 0x38e   :  { %630 = vsyncpa [#allocation3 + $0x1], 1 }
 0x38f   :  { %631 = vsyncpa [#allocation6], 1 }
 0x390   :  { %632 = vsyncpa [#allocation4], 1 }
 0x391   :  { %634 = vsyncpa [#allocation4 + $0x1], 1 }

</bundles_post_ra>
